<compile_context>
chip_gen: v5e
topology: v5e:2x2
jax: 0.10.0
libtpu: 0.0.40
codegen_flags: <defaults>
</compile_context>

<pallas_src>
import functools

import jax
import jax.numpy as jnp
from jax.experimental import pallas as pl
from jax.experimental.pallas import tpu as pltpu


_LANE = 128
_SUBLANE = 8


def _round_up(x: int, m: int) -> int:
    return ((x + m - 1) // m) * m


def _activation(name):
    if name == "relu":
        return lambda x: jnp.maximum(x, 0.0)
    if name == "tanh":
        return jnp.tanh
    if name == "sigmoid":
        return jax.nn.sigmoid
    if name == "elu":
        return lambda x: jnp.where(x > 0, x, jnp.expm1(x))
    if name == "leaky_relu":
        return lambda x: jnp.where(x > 0, x, 0.01 * x)
    if name == "gelu":
        return lambda x: jax.nn.gelu(x, approximate=False)
    raise NotImplementedError(name)


# --------------------------------------------------------------------------
# Kernels
# --------------------------------------------------------------------------

def _oscillator_step_kernel(z_ref, zp_ref, u_ref, w_ref, ab_ref,
                            znew_ref, unew_ref, *, h, act, mm_dtype):
    """One oscillator step for a (tm, out_p) batch tile.

    z_prev arrives in f32 and is cast to the MXU dtype here (saves a whole
    wrapper-side HBM pass); state integration stays in f32.
    """
    a = ab_ref[0:1, :]   # ElementwiseLinear weights, (1, out_p)
    b = ab_ref[1:2, :]   # Linear bias,               (1, out_p)
    pre = (
        a * z_ref[...]
        + jnp.dot(zp_ref[...].astype(mm_dtype), w_ref[...],
                  preferred_element_type=jnp.float32)
        + b
    )
    u_new = u_ref[...] + h * act(pre)
    z_new = z_ref[...] + h * u_new
    unew_ref[...] = u_new
    znew_ref[...] = z_new


def _oscillator_scan_kernel(z0_ref, u0_ref, zp_ref, w_ref, ab_ref,
                            zseq_ref, ufin_ref, z_sc, u_sc, *, h, act, mm_dtype):
    """T fused steps; z/u live in VMEM scratch, only z_prev(t) streamed in and
    z(t) streamed out per step.  Grid = (batch_tiles, T), T innermost."""
    @pl.when(pl.program_id(1) == 0)
    def _():
        z_sc[...] = z0_ref[...]
        u_sc[...] = u0_ref[...]

    a = ab_ref[0:1, :]
    b = ab_ref[1:2, :]
    pre = (
        a * z_sc[...]
        + jnp.dot(zp_ref[0].astype(mm_dtype), w_ref[...],
                  preferred_element_type=jnp.float32)
        + b
    )
    u_new = u_sc[...] + h * act(pre)
    z_new = z_sc[...] + h * u_new
    u_sc[...] = u_new
    z_sc[...] = z_new
    zseq_ref[0] = z_new
    # Written every step in VMEM; HBM writeback only happens when the batch
    # block index changes (end of the t sweep for this tile).
    ufin_ref[...] = u_new


# --------------------------------------------------------------------------
# Tiling / VMEM budgeting
# --------------------------------------------------------------------------

def _vmem_capacity_bytes() -> int:
    try:
        return int(pltpu.get_tpu_info().vmem_capacity_bytes)
    except Exception:
        return 64 << 20   # conservative: assume v7x (smallest VMEM per TC)


def _vmem_estimate(tm, in_p, out_p, mm_itemsize) -> int:
    # Pinned operands (bf16 weight + (2,out_p) a/bias block padded to 8
    # sublanes).  Pallas double-buffers even constant-index inputs, so count
    # both buffers.
    pinned = 2 * (in_p * out_p * mm_itemsize + 8 * out_p * 4)
    # Streamed blocks (double-buffered): z, u, 2 outputs (f32) + z_prev (f32).
    streamed = 2 * tm * (4 * out_p * 4 + in_p * 4)
    # Scan state scratch (upper bound; zero for the single-step kernel).
    scratch = 2 * tm * out_p * 4
    # Elementwise f32 temporaries (pre / act / u_new / z_new) + in-kernel
    # bf16 cast of z_prev.
    temps = tm * (4 * out_p * 4 + in_p * mm_itemsize)
    return pinned + streamed + scratch + temps


def _pick_tm(batch, in_p, out_p, mm_itemsize, budget, cap) -> int:
    if batch <= _SUBLANE:
        return batch                       # single full block (== array dim)
    tm = min(cap, (batch // _SUBLANE) * _SUBLANE)
    # Prefer >= 2 batch blocks so both v7x TensorCores get work, but only
    # while tiles stay in the >=256-row high-pipeline-efficiency regime.
    if tm >= batch and batch >= 512:
        tm = max(_SUBLANE, ((batch // 2) // _SUBLANE) * _SUBLANE)
    while tm > _SUBLANE and _vmem_estimate(tm, in_p, out_p, mm_itemsize) > budget:
        tm = max(_SUBLANE, ((tm // 2) // _SUBLANE) * _SUBLANE)
    return tm


def _tiling(batch, in_p, out_p, mm_dtype):
    mm_itemsize = jnp.dtype(mm_dtype).itemsize
    capacity = _vmem_capacity_bytes()
    budget = int(0.75 * capacity)
    cap = 2048 if capacity >= (100 << 20) else 1024   # v5e/v6e vs v7x
    tm = _pick_tm(batch, in_p, out_p, mm_itemsize, budget, cap)
    vmem_limit = int(min(capacity,
                         _vmem_estimate(tm, in_p, out_p, mm_itemsize) + (8 << 20)))
    return tm, vmem_limit


# --------------------------------------------------------------------------
# Parameter prep (hoisted out of the per-timestep path)
# --------------------------------------------------------------------------

def prepare_oscillator_params(a_weights, B_weight, B_bias,
                              matmul_dtype=jnp.bfloat16):
    """Transpose / pad / cast the layer parameters once.
    B_weight is in PyTorch layout (out_dim, in_dim)."""
    out_dim, in_dim = B_weight.shape
    in_p = _round_up(in_dim, _LANE)
    out_p = _round_up(out_dim, _LANE)

    w_t = jnp.zeros((in_p, out_p), matmul_dtype)
    w_t = w_t.at[:in_dim, :out_dim].set(B_weight.T.astype(matmul_dtype))
    ab = jnp.zeros((2, out_p), jnp.float32)
    ab = ab.at[0, :out_dim].set(a_weights.astype(jnp.float32))
    ab = ab.at[1, :out_dim].set(B_bias.astype(jnp.float32))
    return {"w_t": w_t, "ab": ab,
            "in_dim": in_dim, "out_dim": out_dim, "in_p": in_p, "out_p": out_p}


# --------------------------------------------------------------------------
# Padded-state entry points (production path: no wrapper copies, real aliases)
# --------------------------------------------------------------------------

def neural_oscillator_step_padded(z_p, z_prev_p, u_p, params,
                                  h=0.1, activation="relu"):
    """z_p, u_p: (batch, out_p) f32; z_prev_p: (batch, in_p) f32 (feature dims
    already lane-padded).  batch may be ragged.  Returns padded (z_new, u_new);
    z/u are aliased in-place."""
    batch, out_p = z_p.shape
    in_p = z_prev_p.shape[1]
    assert out_p == params["out_p"] and in_p == params["in_p"]
    assert u_p.shape == z_p.shape and z_prev_p.shape[0] == batch

    w_t, ab = params["w_t"], params["ab"]
    mm_dtype = w_t.dtype
    tm, vmem_limit = _tiling(batch, in_p, out_p, mm_dtype)
    grid = (pl.cdiv(batch, tm),)

    kernel = functools.partial(_oscillator_step_kernel, h=float(h),
                               act=_activation(activation), mm_dtype=mm_dtype)
    row_out = pl.BlockSpec((tm, out_p), lambda i: (i, 0))
    row_in = pl.BlockSpec((tm, in_p), lambda i: (i, 0))

    z_new, u_new = pl.pallas_call(
        kernel,
        grid=grid,
        out_shape=(jax.ShapeDtypeStruct((batch, out_p), jnp.float32),
                   jax.ShapeDtypeStruct((batch, out_p), jnp.float32)),
        in_specs=[
            row_out,                                        # z
            row_in,                                         # z_prev (f32, cast in kernel)
            row_out,                                        # u
            pl.BlockSpec((in_p, out_p), lambda i: (0, 0)),  # B.weight^T (resident bf16)
            pl.BlockSpec((2, out_p), lambda i: (0, 0)),     # [a ; bias]
        ],
        out_specs=(row_out, row_out),
        input_output_aliases={0: 0, 2: 1},                  # z->z_new, u->u_new in place
        compiler_params=pltpu.CompilerParams(
            dimension_semantics=("parallel",),              # batch across TCs on v7x
            vmem_limit_bytes=vmem_limit),
    )(z_p, z_prev_p, u_p, w_t, ab)
    return z_new, u_new


def neural_oscillator_scan_padded(z0_p, u0_p, z_prev_seq_p, params,
                                  h=0.1, activation="relu"):
    """Fused T-step recurrence.  z0_p, u0_p: (batch, out_p) f32;
    z_prev_seq_p: (T, batch, in_p) f32.  Returns (z_seq (T,batch,out_p),
    u_final (batch,out_p)).  z/u stay resident in VMEM scratch across steps.

    Note: for activations with act(0) != 0 (sigmoid/gelu) the padded columns
    accumulate h*act(0) per step; this never leaks into real columns (a, bias
    and the padded weight rows are zero) and is sliced off by the wrapper."""
    T, batch, in_p = z_prev_seq_p.shape
    out_p = z0_p.shape[1]
    assert out_p == params["out_p"] and in_p == params["in_p"]
    assert z0_p.shape == (batch, out_p) and u0_p.shape == (batch, out_p)

    w_t, ab = params["w_t"], params["ab"]
    mm_dtype = w_t.dtype
    tm, vmem_limit = _tiling(batch, in_p, out_p, mm_dtype)
    grid = (pl.cdiv(batch, tm), T)

    kernel = functools.partial(_oscillator_scan_kernel, h=float(h),
                               act=_activation(activation), mm_dtype=mm_dtype)

    z_seq, u_fin = pl.pallas_call(
        kernel,
        grid=grid,
        out_shape=(jax.ShapeDtypeStruct((T, batch, out_p), jnp.float32),
                   jax.ShapeDtypeStruct((batch, out_p), jnp.float32)),
        in_specs=[
            pl.BlockSpec((tm, out_p), lambda i, t: (i, 0)),        # z0 (read once per tile)
            pl.BlockSpec((tm, out_p), lambda i, t: (i, 0)),        # u0 (read once per tile)
            pl.BlockSpec((1, tm, in_p), lambda i, t: (t, i, 0)),   # z_prev(t)
            pl.BlockSpec((in_p, out_p), lambda i, t: (0, 0)),      # weight (resident)
            pl.BlockSpec((2, out_p), lambda i, t: (0, 0)),         # [a ; bias]
        ],
        out_specs=(
            pl.BlockSpec((1, tm, out_p), lambda i, t: (t, i, 0)),  # z trajectory
            pl.BlockSpec((tm, out_p), lambda i, t: (i, 0)),        # u_final
        ),
        scratch_shapes=[pltpu.VMEM((tm, out_p), jnp.float32),      # z state
                        pltpu.VMEM((tm, out_p), jnp.float32)],     # u state
        input_output_aliases={1: 1},                               # u0 -> u_final
        compiler_params=pltpu.CompilerParams(
            dimension_semantics=("parallel", "arbitrary"),
            vmem_limit_bytes=vmem_limit),
    )(z0_p, u0_p, z_prev_seq_p, w_t, ab)
    return z_seq, u_fin


# --------------------------------------------------------------------------
# Convenience wrappers matching the PyTorch layouts (pad/slice once)
# --------------------------------------------------------------------------

def _pad_cols(x, cols):
    x = x.astype(jnp.float32)
    if x.shape[-1] == cols:
        return x
    pad = [(0, 0)] * (x.ndim - 1) + [(0, cols - x.shape[-1])]
    return jnp.pad(x, pad)


def neural_oscillator_step(z, z_prev, u, params, h=0.1, activation="relu"):
    out_dim, out_p, in_p = params["out_dim"], params["out_p"], params["in_p"]
    z_new, u_new = neural_oscillator_step_padded(
        _pad_cols(z, out_p), _pad_cols(z_prev, in_p), _pad_cols(u, out_p),
        params, h=h, activation=activation)
    if out_p != out_dim:
        z_new, u_new = z_new[:, :out_dim], u_new[:, :out_dim]
    return z_new, u_new


def neural_oscillator_scan(z0, u0, z_prev_seq, params, h=0.1, activation="relu"):
    out_dim, out_p, in_p = params["out_dim"], params["out_p"], params["in_p"]
    z_seq, u_fin = neural_oscillator_scan_padded(
        _pad_cols(z0, out_p), _pad_cols(u0, out_p), _pad_cols(z_prev_seq, in_p),
        params, h=h, activation=activation)
    if out_p != out_dim:
        z_seq, u_fin = z_seq[..., :out_dim], u_fin[:, :out_dim]
    return z_seq, u_fin


def neural_oscillator_layer(z, z_prev, u, a_weights, B_weight, B_bias,
                            h=0.1, activation="relu", matmul_dtype=jnp.bfloat16):
    """One-shot convenience wrapper mirroring the PyTorch module's forward.
    Recurrent callers should call prepare_oscillator_params once and use the
    padded step / scan entry points."""
    params = prepare_oscillator_params(a_weights, B_weight, B_bias, matmul_dtype)
    return neural_oscillator_step(z, z_prev, u, params, h=h, activation=activation)


# --------------------------------------------------------------------------
# Reference & self-test
# --------------------------------------------------------------------------

def _reference_step(z, z_prev, u, a_w, B_w, B_b, h, act,
                    matmul_dtype=jnp.float32):
    pre = (a_w * z
           + jnp.dot(z_prev.astype(matmul_dtype), B_w.T.astype(matmul_dtype),
                     preferred_element_type=jnp.float32)
           + B_b)
    u_new = u + h * act(pre)
    z_new = z + h * u_new
    return z_new, u_new


if __name__ == "__main__":
    key = jax.random.PRNGKey(0)
    batch, in_dim, out_dim, T = 8, 16, 32, 6
    h = 0.1

    ks = jax.random.split(key, 7)
    z = jax.random.normal(ks[0], (batch, out_dim), jnp.float32)
    z_prev = jax.random.normal(ks[1], (batch, in_dim), jnp.float32)
    u = jax.random.normal(ks[2], (batch, out_dim), jnp.float32)
    # ElementwiseLinear init is zeros in the module; use small non-zero values
    # here so the a*z path is exercised.
    a_weights = 0.1 * jax.random.normal(ks[3], (out_dim,), jnp.float32)
    bound = in_dim ** -0.5
    B_weight = jax.random.uniform(ks[4], (out_dim, in_dim), jnp.float32, -bound, bound)
    B_bias = jax.random.uniform(ks[5], (out_dim,), jnp.float32, -bound, bound)
    zp_seq = jax.random.normal(ks[6], (T, batch, in_dim), jnp.float32)

    relu = lambda x: jnp.maximum(x, 0.0)
    params = prepare_oscillator_params(a_weights, B_weight, B_bias)

    # --- single step (matches the module's forward) ---
    z_new, u_new = neural_oscillator_step(z, z_prev, u, params, h=h,
                                          activation="relu")
    jax.block_until_ready((z_new, u_new))

    z_rb, u_rb = _reference_step(z, z_prev, u, a_weights, B_weight, B_bias,
                                 h, relu, jnp.bfloat16)
    assert jnp.allclose(z_new, z_rb, atol=1e-4, rtol=1e-4)
    assert jnp.allclose(u_new, u_rb, atol=1e-4, rtol=1e-4)
    z_rf, u_rf = _reference_step(z, z_prev, u, a_weights, B_weight, B_bias,
                                 h, relu, jnp.float32)
    assert jnp.allclose(z_new, z_rf, atol=5e-3, rtol=5e-3)
    assert jnp.allclose(u_new, u_rf, atol=5e-3, rtol=5e-3)

    # --- fused T-step scan (state resident in VMEM) ---
    z_seq, u_fin = neural_oscillator_scan(z, u, zp_seq, params, h=h,
                                          activation="relu")
    jax.block_until_ready((z_seq, u_fin))

    zr, ur = z, u
    zs_ref = []
    for t in range(T):
        zr, ur = _reference_step(zr, zp_seq[t], ur, a_weights, B_weight, B_bias,
                                 h, relu, jnp.bfloat16)
        zs_ref.append(zr)
    zs_ref = jnp.stack(zs_ref)
    assert jnp.allclose(z_seq, zs_ref, atol=5e-4, rtol=5e-4)
    assert jnp.allclose(u_fin, ur, atol=5e-4, rtol=5e-4)

    print("KERNEL_OK")
</pallas_src>

<mosaic_0001>
module attributes {stable_mosaic.version = 11 : i64} {
  func.func @_oscillator_step_kernel(%arg0: i32, %arg1: memref<8x128xf32, #tpu.memory_space<vmem>>, %arg2: memref<8x128xf32, #tpu.memory_space<vmem>>, %arg3: memref<8x128xf32, #tpu.memory_space<vmem>>, %arg4: memref<128x128xbf16, #tpu.memory_space<vmem>>, %arg5: memref<2x128xf32, #tpu.memory_space<vmem>>, %arg6: memref<8x128xf32, #tpu.memory_space<vmem>>, %arg7: memref<8x128xf32, #tpu.memory_space<vmem>>) attributes {dimension_semantics = [#tpu.dimension_semantics<parallel>], iteration_bounds = array<i64: 1>, scalar_prefetch = 0 : i64, scratch_operands = 0 : i64, tpu.core_type = #tpu.core_type<tc>, window_params = [{transform_indices = @transform_0, window_bounds = array<i64: 8, 128>}, {transform_indices = @transform_1, window_bounds = array<i64: 8, 128>}, {transform_indices = @transform_2, window_bounds = array<i64: 8, 128>}, {pipeline_mode = #tpu.pipeline_mode<synchronous>, transform_indices = @transform_3, window_bounds = array<i64: 128, 128>}, {pipeline_mode = #tpu.pipeline_mode<synchronous>, transform_indices = @transform_4, window_bounds = array<i64: 2, 128>}, {transform_indices = @transform_5, window_bounds = array<i64: 8, 128>}, {transform_indices = @transform_6, window_bounds = array<i64: 8, 128>}]} {
    %c0 = arith.constant 0 : index
    %c0_0 = arith.constant 0 : index
    %0 = vector.load %arg5[%c0, %c0_0] : memref<2x128xf32, #tpu.memory_space<vmem>>, vector<1x128xf32>
    %c1 = arith.constant 1 : index
    %c0_1 = arith.constant 0 : index
    %1 = vector.load %arg5[%c1, %c0_1] : memref<2x128xf32, #tpu.memory_space<vmem>>, vector<1x128xf32>
    %c0_2 = arith.constant 0 : index
    %c0_3 = arith.constant 0 : index
    %2 = vector.load %arg1[%c0_2, %c0_3] : memref<8x128xf32, #tpu.memory_space<vmem>>, vector<8x128xf32>
    %3 = vector.broadcast %0 : vector<1x128xf32> to vector<8x128xf32>
    %4 = arith.mulf %3, %2 : vector<8x128xf32>
    %c0_4 = arith.constant 0 : index
    %c0_5 = arith.constant 0 : index
    %5 = vector.load %arg2[%c0_4, %c0_5] : memref<8x128xf32, #tpu.memory_space<vmem>>, vector<8x128xf32>
    %6 = arith.truncf %5 : vector<8x128xf32> to vector<8x128xbf16>
    %c0_6 = arith.constant 0 : index
    %c0_7 = arith.constant 0 : index
    %7 = vector.load %arg4[%c0_6, %c0_7] : memref<128x128xbf16, #tpu.memory_space<vmem>>, vector<128x128xbf16>
    %cst = arith.constant dense<0.000000e+00> : vector<8x128xf32>
    %8 = tpu.matmul %6, %7, %cst {dimension_numbers = #tpu.dot_dimension_numbers<[1], [0], [0], [1], [0, 0, 1, 1], [], []>} : vector<8x128xbf16>, vector<128x128xbf16>, vector<8x128xf32> -> vector<8x128xf32>
    %9 = arith.addf %4, %8 : vector<8x128xf32>
    %10 = vector.broadcast %1 : vector<1x128xf32> to vector<8x128xf32>
    %11 = arith.addf %9, %10 : vector<8x128xf32>
    %c0_8 = arith.constant 0 : index
    %c0_9 = arith.constant 0 : index
    %12 = vector.load %arg3[%c0_8, %c0_9] : memref<8x128xf32, #tpu.memory_space<vmem>>, vector<8x128xf32>
    %cst_10 = arith.constant 0.000000e+00 : f32
    %13 = vector.broadcast %cst_10 : f32 to vector<8x128xf32>
    %14 = arith.maximumf %11, %13 : vector<8x128xf32>
    %cst_11 = arith.constant 1.000000e-01 : f32
    %15 = vector.broadcast %cst_11 : f32 to vector<8x128xf32>
    %16 = arith.mulf %15, %14 : vector<8x128xf32>
    %17 = arith.addf %12, %16 : vector<8x128xf32>
    %c0_12 = arith.constant 0 : index
    %c0_13 = arith.constant 0 : index
    %18 = vector.load %arg1[%c0_12, %c0_13] : memref<8x128xf32, #tpu.memory_space<vmem>>, vector<8x128xf32>
    %cst_14 = arith.constant 1.000000e-01 : f32
    %19 = vector.broadcast %cst_14 : f32 to vector<8x128xf32>
    %20 = arith.mulf %19, %17 : vector<8x128xf32>
    %21 = arith.addf %18, %20 : vector<8x128xf32>
    %c0_15 = arith.constant 0 : index
    %c0_16 = arith.constant 0 : index
    %22 = vector.load %arg7[%c0_15, %c0_16] : memref<8x128xf32, #tpu.memory_space<vmem>>, vector<8x128xf32>
    tpu.vector_store %arg7[%c0_15, %c0_16], %17 {strides = array<i32>} : memref<8x128xf32, #tpu.memory_space<vmem>>, vector<8x128xf32>,
    %c0_17 = arith.constant 0 : index
    %c0_18 = arith.constant 0 : index
    %23 = vector.load %arg6[%c0_17, %c0_18] : memref<8x128xf32, #tpu.memory_space<vmem>>, vector<8x128xf32>
    tpu.vector_store %arg6[%c0_17, %c0_18], %21 {strides = array<i32>} : memref<8x128xf32, #tpu.memory_space<vmem>>, vector<8x128xf32>,
    return
  }
  func.func @transform_0(%arg0: i32) -> (i32, i32) {
    %c0_i32 = arith.constant 0 : i32
    %c0_i32_0 = arith.constant 0 : i32
    return %arg0, %c0_i32 : i32, i32
  }
  func.func @transform_1(%arg0: i32) -> (i32, i32) {
    %c0_i32 = arith.constant 0 : i32
    %c0_i32_0 = arith.constant 0 : i32
    return %arg0, %c0_i32 : i32, i32
  }
  func.func @transform_2(%arg0: i32) -> (i32, i32) {
    %c0_i32 = arith.constant 0 : i32
    %c0_i32_0 = arith.constant 0 : i32
    return %arg0, %c0_i32 : i32, i32
  }
  func.func @transform_3(%arg0: i32) -> (i32, i32) {
    %c0_i32 = arith.constant 0 : i32
    %c0_i32_0 = arith.constant 0 : i32
    %c0_i32_1 = arith.constant 0 : i32
    return %c0_i32, %c0_i32_0 : i32, i32
  }
  func.func @transform_4(%arg0: i32) -> (i32, i32) {
    %c0_i32 = arith.constant 0 : i32
    %c0_i32_0 = arith.constant 0 : i32
    %c0_i32_1 = arith.constant 0 : i32
    return %c0_i32, %c0_i32_0 : i32, i32
  }
  func.func @transform_5(%arg0: i32) -> (i32, i32) {
    %c0_i32 = arith.constant 0 : i32
    %c0_i32_0 = arith.constant 0 : i32
    return %arg0, %c0_i32 : i32, i32
  }
  func.func @transform_6(%arg0: i32) -> (i32, i32) {
    %c0_i32 = arith.constant 0 : i32
    %c0_i32_0 = arith.constant 0 : i32
    return %arg0, %c0_i32 : i32, i32
  }
}

</mosaic_0001>

<bundles_post_ra>
// kernel: tpu_custom_call.1
= control target key start
LH: loop header
LB: loop body
LE: loop exit
PB: predicated region body
PF: predicated region fallthrough
CT: control target
= control target key end

     0   :  { %12 = vsyncpa [#allocation3], 0  ;;  %s439_s0 = inlined_call_operand.hbm [shape: f32[8,128], index: 0, kind: input, shape index: {}, may-alias: {0,5}]   ;;  %s440_s1 = inlined_call_operand.vmem [shape: f32[8,128], index: 1, kind: input, shape index: {}]   ;;  %s441_s2 = inlined_call_operand.hbm [shape: f32[8,128], index: 2, kind: input, shape index: {}, may-alias: {2,6}]   ;;  %s442_s3 = inlined_call_operand.hbm [shape: bf16[128,128], index: 3, kind: input, shape index: {}]   ;;  %s443_s4 = inlined_call_operand.vmem [shape: f32[2,128], index: 4, kind: input, shape index: {}]   ;;  %s444_s5 = inlined_call_operand.hbm [shape: f32[8,128], index: 5, kind: output, shape index: {0}, may-alias: {0,5}]   ;;  %s445_s6 = inlined_call_operand.hbm [shape: f32[8,128], index: 6, kind: output, shape index: {1}, may-alias: {2,6}]  }
   0x1   :  { %13 = vsyncpa [#allocation6], 0 }
   0x2   :  { %14 = vsyncpa [#allocation4], 0  ;;  %s34_s23 = sshll.u32 %s441_s2, 4  ;;  %s35_s23 = int_to_ptr.hbm [resolvable:$true] %s34_s23 }
   0x3   :  { %15 = vsyncpa [#allocation10], 0  ;;  %s373_s24 = smov [#allocation5]   ;;  %s21_s28 = sshll.u32 %s439_s0, 4  ;;  %s22_s28 = int_to_ptr.hbm [resolvable:$true] %s21_s28 }
   0x4   :  { %s36_s25 = sshll.u32 %s373_s24, 4  ;;  %s374_s29 = smov [#allocation2]   ;;  %s37_s25 = int_to_ptr.vmem [resolvable:$true] %s36_s25 }
   0x5   :  { %39 = dma.hbm_to_vmem [thread:$0]  %s35_s23, 128, %s37_s25, [#allocation6]  }
   0x6   :  { %s23_s30 = sshll.u32 %s374_s29, 4  ;;  %s44_s9 = sshll.u32 %s442_s3, 4  ;;  %s24_s30 = int_to_ptr.vmem [resolvable:$true] %s23_s30  ;;  %s45_s9 = int_to_ptr.hbm [resolvable:$true] %s44_s9 }
   0x7   :  { %26 = dma.hbm_to_vmem [thread:$0]  %s22_s28, 128, %s24_s30, [#allocation3]  }
   0x8   :  { %s375_s2 = smov [#allocation7]   ;;  %s376_s11 = smov 64  }
   0x9   :  { %s46_s10 = sshll.u32 %s375_s2, 4  ;;  %s377_s12 = smov 4   ;;  %s47_s10 = int_to_ptr.vmem [resolvable:$true] %s46_s10 }
   0xa   :  { %52 = dma.hbm_to_vmem [thread:$0]  %s45_s9, 1024, %s47_s10, [#allocation6], %s376_s11, %s376_s11, %s377_s12  }
   0xb   :  { %365 = dma.done.wait [#allocation3], 128  }
   0xc   :  { %366 = vsyncadd [#allocation3], 4294967168 }
   0xd   :  { %367 = dma.done.wait [#allocation6], 1152  }
   0xe   :  { %368 = vsyncadd [#allocation6], 4294966144  ;;  %v235_v0 = vld [vmem:[#allocation7 + $0x38] sm:$0xff]  ;;  %v234_v1 = vld [vmem:[#allocation7 + $0x30] sm:$0xff]  ;;  %s378_s17 = smov [#allocation9]   ;;  %s180_s20 = sshll.u32 %s445_s6, 4  ;;  %s181_s20 = int_to_ptr.hbm [resolvable:$true] %s180_s20 }
   0xf   :  { %138 = vmatpush.bf16.msra.mxu0 %v235_v0  ;;  %v233_v2 = vld [vmem:[#allocation7 + $0x28] sm:$0xff]  ;;  %v232_v3 = vld [vmem:[#allocation7 + $0x20] sm:$0xff]  ;;  %v231_v4 = vld [vmem:[#allocation7 + $0x18] sm:$0xff]  ;;  %s379_s21 = smov [#allocation8]   ;;  %s169_s24 = sshll.u32 %s444_s5, 4  ;;  %s170_s24 = int_to_ptr.hbm [resolvable:$true] %s169_s24 }
  0x10   :  { %v230_v5 = vld [vmem:[#allocation7 + $0x10] sm:$0xff]  ;;  %v229_v6 = vld [vmem:[#allocation7 + $0x8] sm:$0xff]  ;;  %v228_v7 = vld [vmem:[#allocation7] sm:$0xff]  ;;  %s167_s22 = sshll.u32 %s379_s21, 4  ;;  %s168_s22 = int_to_ptr.vmem [resolvable:$true] %s167_s22 }
  0x11   :  { %v72_v8 = vld [vmem:[%s440_s1] sm:$0xff]  ;;  %v154_v18 = vld [vmem:[#allocation5] sm:$0xff]  ;;  %s178_s1 = sshll.u32 %s378_s17, 4  ;;  %s179_s1 = int_to_ptr.vmem [resolvable:$true] %s178_s1 }
  0x12   :  { %v73_v9 = vpack.c.bf16 %v72_v8, %v72_v8  ;;  %v243_v10 = vld [vmem:[%s443_s4] ss:$0 sm:$0xff]  ;;  %v244_v13 = vld [vmem:[%s443_s4 + $0x1] ss:$0 sm:$0xff] }
  0x13   :  { %139 = vmatpush.bf16.msra.mxu0 %v234_v1  ;;  %v69_v11 = vld [vmem:[#allocation2] sm:$0xff] }
  0x14   :  { %v71_v12 = vmul.f32 %v243_v10, %v69_v11 }
  0x17   :  { %140 = vmatpush.bf16.msra.mxu0 %v233_v2 }
  0x1b   :  { %141 = vmatpush.bf16.msra.mxu0 %v232_v3 }
  0x1f   :  { %142 = vmatpush.bf16.msra.mxu0 %v231_v4 }
  0x23   :  { %143 = vmatpush.bf16.msra.mxu0 %v230_v5 }
  0x27   :  { %144 = vmatpush.bf16.msra.mxu0 %v229_v6 }
  0x2b   :  { %145 = vmatpush.bf16.msra.mxu0 %v228_v7 }
  0x2e   :  { %146 = vmatmul.bf16.vlgmr.msra.gmra.mxu0 %v73_v9 }
  0xab   :  { %v147_v14 = vpop.f32.mrf.mxu0 }
  0xac   :  { %v151_v15 = vadd.f32 %v147_v14, %v71_v12 }
  0xae   :  { %v153_v16 = vadd.f32 %v244_v13, %v151_v15 }
  0xb0   :  { %v155_v17 = vmax.f32 %v153_v16, 0.0 }
  0xb2   :  { %v156_v19 = vmul.f32 0.1, %v155_v17 }
  0xb3   :  { %v149_v20 = vpop.f32.mrf.mxu0 }
  0xb4   :  { %v157_v21 = vadd.f32 %v156_v19, %v154_v18 }
  0xb6   :  { %v158_v22 = vmul.f32 0.1, %v157_v21  ;;  %160 = vst [vmem:[#allocation9] sm:$0xff] %v157_v21 }
  0xb7   :  { %183 = dma.vmem_to_hbm [thread:$0]  %s179_s1, 128, %s181_s20, [#allocation10]  }
  0xb8   :  { %v159_v23 = vadd.f32 %v158_v22, %v69_v11 }
  0xba   :  { %161 = vst [vmem:[#allocation8] sm:$0xff] %v159_v23 }
  0xbb   :  { %172 = dma.vmem_to_hbm [thread:$0]  %s168_s22, 128, %s170_s24, [#allocation4]  }
  0xbc   :  { %369 = dma.done.wait [#allocation4], 128  }
  0xbd   :  { %370 = vsyncadd [#allocation4], 4294967168 }
  0xbe   :  { %371 = dma.done.wait [#allocation10], 128  }
  0xbf   :  { %372 = vsyncadd [#allocation10], 4294967168 }
  0xc0   :  { %192 = vsyncpa [#allocation3], 1 }
  0xc1   :  { %193 = vsyncpa [#allocation6], 1 }
  0xc2   :  { %194 = vsyncpa [#allocation4], 1 }
  0xc3   :  { %195 = vsyncpa [#allocation10], 1 }

</bundles_post_ra>
